<compile_context>
chip_gen: v7x
topology: tpu7x:2x2x1
jax: 0.10.0
libtpu: 0.0.40
codegen_flags: <defaults>
</compile_context>

<pallas_src>
import functools

import jax
import jax.numpy as jnp
from jax.experimental import pallas as pl
from jax.experimental.pallas import tpu as pltpu

H1, H2 = 400, 300          # true hidden widths (match the PyTorch module)
H1_P, H2_P = 512, 384      # lane-padded hidden widths (multiples of 128)
LANE = 128
SUBLANE_BF16 = 16          # bf16 packs two rows per sublane -> 16-row rounding


def _round_up(x, m):
    return (x + m - 1) // m * m


def _actor_kernel(s_ref, w1_ref, b1_ref, w2_ref, b2_ref, w3_ref, b3_ref,
                  o_ref, *, a_max):
    # Layer 1: (TB, Ns_p)bf16 @ (Ns_p, 512)bf16 -> f32 acc, bias+relu in f32.
    h1 = jnp.dot(s_ref[...], w1_ref[...], preferred_element_type=jnp.float32)
    h1 = jnp.maximum(h1 + b1_ref[...], 0.0)

    # Layer 2: (TB, 512)bf16 @ (512, 384)bf16 -> f32 acc, bias+relu in f32.
    h2 = jnp.dot(h1.astype(jnp.bfloat16), w2_ref[...],
                 preferred_element_type=jnp.float32)
    h2 = jnp.maximum(h2 + b2_ref[...], 0.0)

    # Layer 3: (TB, 384)bf16 @ (384, Na_p)bf16 -> f32 acc, tanh*a_max in f32.
    h3 = jnp.dot(h2.astype(jnp.bfloat16), w3_ref[...],
                 preferred_element_type=jnp.float32)
    o_ref[...] = (jnp.tanh(h3 + b3_ref[...]) * a_max).astype(o_ref.dtype)


def _choose_batch_tile(B, tb):
    """Batch-tile size TB.

    * tile count derived from the budget (n = cdiv(B, tb)) so per-tile batch
      padding is bounded by <16 rows (never a near-full dead tile);
    * at least 2 tiles once B >= 32 so "parallel" semantics can shard the grid
      across v7x's two TensorCores;
    * 16-row granularity keeps bf16 input tiles on fully packed vregs.
    """
    n_tiles = max(1, pl.cdiv(B, tb))
    if B >= 32:
        n_tiles = max(n_tiles, 2)
    return _round_up(pl.cdiv(B, n_tiles), SUBLANE_BF16)


def actor_forward(s, prepped, a_max, *, tb=1024):
    """Runs the Actor MLP forward pass with a Pallas kernel.

    s: (B, Ns) float32 state batch.
    prepped: output of prepare_actor_params (lane-padded, bf16 weights).
    Returns (B, Na) float32 actions.
    """
    w1, b1 = prepped["w1"], prepped["b1"]
    w2, b2 = prepped["w2"], prepped["b2"]
    w3, b3 = prepped["w3"], prepped["b3"]
    Na = prepped["Na"]

    B, Ns = s.shape
    Ns_p, H1p = w1.shape
    H2p = w2.shape[1]
    Na_p = w3.shape[1]

    TB = _choose_batch_tile(B, tb)
    B_p = _round_up(B, TB)
    grid = (B_p // TB,)

    # Pad + cast the state once outside the kernel (halves activation DMA,
    # makes every load lane/sublane aligned).
    s_p = jnp.zeros((B_p, Ns_p), jnp.bfloat16).at[:B, :Ns].set(
        s.astype(jnp.bfloat16))

    flops = 2 * B_p * (Ns_p * H1p + H1p * H2p + H2p * Na_p)
    bytes_accessed = (
        (w1.size + w2.size + w3.size) * 2          # bf16 weights (DMA'd once)
        + (b1.size + b2.size + b3.size) * 4        # f32 biases
        + s_p.size * 2                             # bf16 input
        + B_p * Na_p * 4)                          # f32 output
    cost = pl.CostEstimate(flops=flops,
                           transcendentals=B_p * Na_p,
                           bytes_accessed=bytes_accessed)

    # VMEM budget: single-buffered weights/biases, double-buffered s/out
    # tiles, f32 h1/h2 intermediates; 2x headroom, floor 32 MiB (covers v5e's
    # 16 MiB default when TB is large), cap 64 MiB.
    vmem_est = (
        (w1.size + w2.size + w3.size) * 2
        + (b1.size + b2.size + b3.size) * 4
        + 2 * TB * Ns_p * 2          # double-buffered bf16 input tile
        + 2 * TB * Na_p * 4          # double-buffered f32 output tile
        + TB * (H1p + H2p) * 4)      # f32 intermediates
    vmem_limit = int(min(max(2 * vmem_est, 32 << 20), 64 << 20))

    kernel = functools.partial(_actor_kernel, a_max=float(a_max))

    # Weights/biases: constant block index -> DMA'd once, VMEM-resident across
    # all batch tiles; single buffer (no point double-buffering constants).
    const = lambda i: (0, 0)
    one_buf = pl.Buffered(1)

    out = pl.pallas_call(
        kernel,
        out_shape=jax.ShapeDtypeStruct((B_p, Na_p), jnp.float32),
        grid=grid,
        in_specs=[
            # Activations: tiled over the batch grid axis.
            pl.BlockSpec((TB, Ns_p), lambda i: (i, 0)),
            pl.BlockSpec((Ns_p, H1p), const, pipeline_mode=one_buf),
            pl.BlockSpec((1, H1p), const, pipeline_mode=one_buf),
            pl.BlockSpec((H1p, H2p), const, pipeline_mode=one_buf),
            pl.BlockSpec((1, H2p), const, pipeline_mode=one_buf),
            pl.BlockSpec((H2p, Na_p), const, pipeline_mode=one_buf),
            pl.BlockSpec((1, Na_p), const, pipeline_mode=one_buf),
        ],
        out_specs=pl.BlockSpec((TB, Na_p), lambda i: (i, 0)),
        compiler_params=pltpu.CompilerParams(
            dimension_semantics=("parallel",),
            vmem_limit_bytes=vmem_limit),
        cost_estimate=cost,
    )(s_p, w1, b1, w2, b2, w3, b3)

    # Strip batch / lane padding.
    return out[:B, :Na]


def init_actor_params(key, Ns, Na):
    """Deterministic init mimicking PyTorch's default Linear init
    (uniform in [-1/sqrt(fan_in), 1/sqrt(fan_in)]). True shapes, float32."""
    def linear(key, fan_in, fan_out):
        kw, kb = jax.random.split(key)
        bound = 1.0 / jnp.sqrt(jnp.float32(fan_in))
        w = jax.random.uniform(kw, (fan_in, fan_out), jnp.float32,
                               minval=-bound, maxval=bound)
        b = jax.random.uniform(kb, (1, fan_out), jnp.float32,
                               minval=-bound, maxval=bound)
        return w, b

    k1, k2, k3 = jax.random.split(key, 3)
    w1, b1 = linear(k1, Ns, H1)
    w2, b2 = linear(k2, H1, H2)
    w3, b3 = linear(k3, H2, Na)
    return {"w1": w1, "b1": b1, "w2": w2, "b2": b2, "w3": w3, "b3": b3}


def prepare_actor_params(params):
    """One-time prep: zero-pad every dim to a lane/MXU-friendly multiple and
    cast matmul weights to bfloat16 (biases stay float32)."""
    w1, b1 = params["w1"], params["b1"]
    w2, b2 = params["w2"], params["b2"]
    w3, b3 = params["w3"], params["b3"]
    Ns, Na = w1.shape[0], w3.shape[1]
    Ns_p = _round_up(Ns, LANE)
    Na_p = _round_up(Na, LANE)

    def pad2d(a, shape):
        return jnp.zeros(shape, a.dtype).at[:a.shape[0], :a.shape[1]].set(a)

    return {
        "w1": pad2d(w1, (Ns_p, H1_P)).astype(jnp.bfloat16),
        "b1": pad2d(b1, (1, H1_P)),
        "w2": pad2d(w2, (H1_P, H2_P)).astype(jnp.bfloat16),
        "b2": pad2d(b2, (1, H2_P)),
        "w3": pad2d(w3, (H2_P, Na_p)).astype(jnp.bfloat16),
        "b3": pad2d(b3, (1, Na_p)),
        "Na": Na,
    }


def _references(s, params, a_max):
    """(bf16-precision-matched reference, pure-f32 reference)."""
    f32 = jnp.float32
    s_b = s.astype(jnp.bfloat16).astype(f32)
    w1b = params["w1"].astype(jnp.bfloat16).astype(f32)
    w2b = params["w2"].astype(jnp.bfloat16).astype(f32)
    w3b = params["w3"].astype(jnp.bfloat16).astype(f32)
    h = jnp.maximum(s_b @ w1b + params["b1"], 0.0)
    h = jnp.maximum(h.astype(jnp.bfloat16).astype(f32) @ w2b + params["b2"], 0.0)
    ref_bf16 = jnp.tanh(h.astype(jnp.bfloat16).astype(f32) @ w3b
                        + params["b3"]) * a_max

    hf = jnp.maximum(s @ params["w1"] + params["b1"], 0.0)
    hf = jnp.maximum(hf @ params["w2"] + params["b2"], 0.0)
    ref_f32 = jnp.tanh(hf @ params["w3"] + params["b3"]) * a_max
    return ref_bf16, ref_f32


if __name__ == "__main__":
    key = jax.random.PRNGKey(0)
    k_params, k_state, k_state2 = jax.random.split(key, 3)

    Ns, Na = 16, 4
    a_max = 2.0

    params = init_actor_params(k_params, Ns, Na)
    prepped = prepare_actor_params(params)

    # Small inference-style batch (grid = (1,)).
    B = 2
    s = jax.random.normal(k_state, (B, Ns), jnp.float32)
    out = jax.block_until_ready(actor_forward(s, prepped, a_max))
    assert out.shape == (B, Na)
    ref_bf16, ref_f32 = _references(s, params, a_max)
    assert jnp.allclose(out, ref_bf16, atol=2e-3, rtol=2e-3)
    assert jnp.allclose(out, ref_f32, atol=5e-2, rtol=5e-2)

    # Larger batch exercising the multi-tile path (>=2 tiles for v7x megacore,
    # plus padded batch rows that must be discarded correctly).
    B2 = 48
    s2 = jax.random.normal(k_state2, (B2, Ns), jnp.float32)
    out2 = jax.block_until_ready(actor_forward(s2, prepped, a_max))
    assert out2.shape == (B2, Na)
    ref2_bf16, ref2_f32 = _references(s2, params, a_max)
    assert jnp.allclose(out2, ref2_bf16, atol=2e-3, rtol=2e-3)
    assert jnp.allclose(out2, ref2_f32, atol=5e-2, rtol=5e-2)

    print("KERNEL_OK")
</pallas_src>

<mosaic_0001>
module attributes {stable_mosaic.version = 11 : i64} {
  func.func @_actor_kernel(%arg0: i32, %arg1: memref<16x128xbf16, #tpu.memory_space<vmem>>, %arg2: memref<128x512xbf16, #tpu.memory_space<vmem>>, %arg3: memref<1x512xf32, #tpu.memory_space<vmem>>, %arg4: memref<512x384xbf16, #tpu.memory_space<vmem>>, %arg5: memref<1x384xf32, #tpu.memory_space<vmem>>, %arg6: memref<384x128xbf16, #tpu.memory_space<vmem>>, %arg7: memref<1x128xf32, #tpu.memory_space<vmem>>, %arg8: memref<16x128xf32, #tpu.memory_space<vmem>>) attributes {dimension_semantics = [#tpu.dimension_semantics<parallel>], iteration_bounds = array<i64: 1>, scalar_prefetch = 0 : i64, scratch_operands = 0 : i64, tpu.core_type = #tpu.core_type<tc>, window_params = [{transform_indices = @transform_0, window_bounds = array<i64: 16, 128>}, {pipeline_mode = #tpu.pipeline_mode<synchronous>, transform_indices = @transform_1, window_bounds = array<i64: 128, 512>}, {pipeline_mode = #tpu.pipeline_mode<synchronous>, transform_indices = @transform_2, window_bounds = array<i64: 1, 512>}, {pipeline_mode = #tpu.pipeline_mode<synchronous>, transform_indices = @transform_3, window_bounds = array<i64: 512, 384>}, {pipeline_mode = #tpu.pipeline_mode<synchronous>, transform_indices = @transform_4, window_bounds = array<i64: 1, 384>}, {pipeline_mode = #tpu.pipeline_mode<synchronous>, transform_indices = @transform_5, window_bounds = array<i64: 384, 128>}, {pipeline_mode = #tpu.pipeline_mode<synchronous>, transform_indices = @transform_6, window_bounds = array<i64: 1, 128>}, {transform_indices = @transform_7, window_bounds = array<i64: 16, 128>}]} {
    %c0 = arith.constant 0 : index
    %c0_0 = arith.constant 0 : index
    %0 = vector.load %arg1[%c0, %c0_0] : memref<16x128xbf16, #tpu.memory_space<vmem>>, vector<16x128xbf16>
    %c0_1 = arith.constant 0 : index
    %c0_2 = arith.constant 0 : index
    %1 = vector.load %arg2[%c0_1, %c0_2] : memref<128x512xbf16, #tpu.memory_space<vmem>>, vector<128x512xbf16>
    %cst = arith.constant dense<0.000000e+00> : vector<16x512xf32>
    %2 = tpu.matmul %0, %1, %cst {dimension_numbers = #tpu.dot_dimension_numbers<[1], [0], [0], [1], [0, 0, 1, 1], [], []>} : vector<16x128xbf16>, vector<128x512xbf16>, vector<16x512xf32> -> vector<16x512xf32>
    %c0_3 = arith.constant 0 : index
    %c0_4 = arith.constant 0 : index
    %3 = vector.load %arg3[%c0_3, %c0_4] : memref<1x512xf32, #tpu.memory_space<vmem>>, vector<1x512xf32>
    %4 = vector.broadcast %3 : vector<1x512xf32> to vector<16x512xf32>
    %5 = arith.addf %2, %4 : vector<16x512xf32>
    %cst_5 = arith.constant 0.000000e+00 : f32
    %6 = vector.broadcast %cst_5 : f32 to vector<16x512xf32>
    %7 = arith.maximumf %5, %6 : vector<16x512xf32>
    %8 = arith.truncf %7 : vector<16x512xf32> to vector<16x512xbf16>
    %c0_6 = arith.constant 0 : index
    %c0_7 = arith.constant 0 : index
    %9 = vector.load %arg4[%c0_6, %c0_7] : memref<512x384xbf16, #tpu.memory_space<vmem>>, vector<512x384xbf16>
    %cst_8 = arith.constant dense<0.000000e+00> : vector<16x384xf32>
    %10 = tpu.matmul %8, %9, %cst_8 {dimension_numbers = #tpu.dot_dimension_numbers<[1], [0], [0], [1], [0, 0, 1, 1], [], []>} : vector<16x512xbf16>, vector<512x384xbf16>, vector<16x384xf32> -> vector<16x384xf32>
    %c0_9 = arith.constant 0 : index
    %c0_10 = arith.constant 0 : index
    %11 = vector.load %arg5[%c0_9, %c0_10] : memref<1x384xf32, #tpu.memory_space<vmem>>, vector<1x384xf32>
    %12 = vector.broadcast %11 : vector<1x384xf32> to vector<16x384xf32>
    %13 = arith.addf %10, %12 : vector<16x384xf32>
    %cst_11 = arith.constant 0.000000e+00 : f32
    %14 = vector.broadcast %cst_11 : f32 to vector<16x384xf32>
    %15 = arith.maximumf %13, %14 : vector<16x384xf32>
    %16 = arith.truncf %15 : vector<16x384xf32> to vector<16x384xbf16>
    %c0_12 = arith.constant 0 : index
    %c0_13 = arith.constant 0 : index
    %17 = vector.load %arg6[%c0_12, %c0_13] : memref<384x128xbf16, #tpu.memory_space<vmem>>, vector<384x128xbf16>
    %cst_14 = arith.constant dense<0.000000e+00> : vector<16x128xf32>
    %18 = tpu.matmul %16, %17, %cst_14 {dimension_numbers = #tpu.dot_dimension_numbers<[1], [0], [0], [1], [0, 0, 1, 1], [], []>} : vector<16x384xbf16>, vector<384x128xbf16>, vector<16x128xf32> -> vector<16x128xf32>
    %c0_15 = arith.constant 0 : index
    %c0_16 = arith.constant 0 : index
    %19 = vector.load %arg7[%c0_15, %c0_16] : memref<1x128xf32, #tpu.memory_space<vmem>>, vector<1x128xf32>
    %20 = vector.broadcast %19 : vector<1x128xf32> to vector<16x128xf32>
    %21 = arith.addf %18, %20 : vector<16x128xf32>
    %22 = math.tanh %21 : vector<16x128xf32>
    %cst_17 = arith.constant 2.000000e+00 : f32
    %23 = vector.broadcast %cst_17 : f32 to vector<16x128xf32>
    %24 = arith.mulf %22, %23 : vector<16x128xf32>
    %c0_18 = arith.constant 0 : index
    %c0_19 = arith.constant 0 : index
    %25 = vector.load %arg8[%c0_18, %c0_19] : memref<16x128xf32, #tpu.memory_space<vmem>>, vector<16x128xf32>
    tpu.vector_store %arg8[%c0_18, %c0_19], %24 {strides = array<i32>} : memref<16x128xf32, #tpu.memory_space<vmem>>, vector<16x128xf32>,
    return
  }
  func.func @transform_0(%arg0: i32) -> (i32, i32) {
    %c0_i32 = arith.constant 0 : i32
    %c0_i32_0 = arith.constant 0 : i32
    return %arg0, %c0_i32 : i32, i32
  }
  func.func @transform_1(%arg0: i32) -> (i32, i32) {
    %c0_i32 = arith.constant 0 : i32
    %c0_i32_0 = arith.constant 0 : i32
    %c0_i32_1 = arith.constant 0 : i32
    return %c0_i32, %c0_i32_0 : i32, i32
  }
  func.func @transform_2(%arg0: i32) -> (i32, i32) {
    %c0_i32 = arith.constant 0 : i32
    %c0_i32_0 = arith.constant 0 : i32
    %c0_i32_1 = arith.constant 0 : i32
    return %c0_i32, %c0_i32_0 : i32, i32
  }
  func.func @transform_3(%arg0: i32) -> (i32, i32) {
    %c0_i32 = arith.constant 0 : i32
    %c0_i32_0 = arith.constant 0 : i32
    %c0_i32_1 = arith.constant 0 : i32
    return %c0_i32, %c0_i32_0 : i32, i32
  }
  func.func @transform_4(%arg0: i32) -> (i32, i32) {
    %c0_i32 = arith.constant 0 : i32
    %c0_i32_0 = arith.constant 0 : i32
    %c0_i32_1 = arith.constant 0 : i32
    return %c0_i32, %c0_i32_0 : i32, i32
  }
  func.func @transform_5(%arg0: i32) -> (i32, i32) {
    %c0_i32 = arith.constant 0 : i32
    %c0_i32_0 = arith.constant 0 : i32
    %c0_i32_1 = arith.constant 0 : i32
    return %c0_i32, %c0_i32_0 : i32, i32
  }
  func.func @transform_6(%arg0: i32) -> (i32, i32) {
    %c0_i32 = arith.constant 0 : i32
    %c0_i32_0 = arith.constant 0 : i32
    %c0_i32_1 = arith.constant 0 : i32
    return %c0_i32, %c0_i32_0 : i32, i32
  }
  func.func @transform_7(%arg0: i32) -> (i32, i32) {
    %c0_i32 = arith.constant 0 : i32
    %c0_i32_0 = arith.constant 0 : i32
    return %arg0, %c0_i32 : i32, i32
  }
}

</mosaic_0001>

<bundles_post_ra>
// kernel: tpu_custom_call.1
= control target key start
LH: loop header
LB: loop body
LE: loop exit
PB: predicated region body
PF: predicated region fallthrough
CT: control target
= control target key end

     0   :  { %12 = vsyncpa [#allocation3], 0  ;;  %s2301_s0 = inlined_call_operand.hbm [shape: bf16[16,128], index: 0, kind: input, shape index: {}]   ;;  %s2302_s1 = inlined_call_operand.hbm [shape: bf16[128,512], index: 1, kind: input, shape index: {}]   ;;  %s2303_s2 = inlined_call_operand.vmem [shape: f32[1,512], index: 2, kind: input, shape index: {}]   ;;  %s2304_s3 = inlined_call_operand.hbm [shape: bf16[512,384], index: 3, kind: input, shape index: {}]   ;;  %s2305_s4 = inlined_call_operand.vmem [shape: f32[1,384], index: 4, kind: input, shape index: {}]   ;;  %s2306_s5 = inlined_call_operand.hbm [shape: bf16[384,128], index: 5, kind: input, shape index: {}]   ;;  %s2307_s6 = inlined_call_operand.vmem [shape: f32[1,128], index: 6, kind: input, shape index: {}]   ;;  %s2308_s7 = inlined_call_operand.hbm [shape: f32[16,128], index: 7, kind: output, shape index: {}]  }
   0x1   :  { %13 = vsyncpa [#allocation6], 0 }
   0x2   :  { %14 = vsyncpa [#allocation9], 0 }
   0x3   :  { %15 = vsyncpa [#allocation4], 0  ;;  %s2139_s24 = smov [#allocation5]   ;;  %s2021_s28 = scalar_lea.hbm %s2302_s1, 4096 }
   0x4   :  { %s33_s25 = sshll.u32 %s2139_s24, 4  ;;  %p2022_p0 = scmp.ne.s32.totalorder %s2302_s1, %s2021_s28  ;;  %s34_s25 = int_to_ptr.vmem [resolvable:$true] %s33_s25 }
   0x5   :  { %p2025_p1 = scmp.lt.u32.totalorder %s2021_s28, %s2302_s1 }
   0x7   :  { %p2027_p2 = pnand %p2025_p1, %p2022_p0 }
   0x9   :  { %2030 = shalt.err (!%p2027_p2)
}
   0xa   :  { %s2031_s10 = scalar_lea.vmem %s34_s25, 4096  ;;  %p2036_p4 = scmp.lt.s32.totalorder %s34_s25, %s34_s25 }
   0xb   :  { %p2032_p3 = scmp.ne.s32.totalorder %s34_s25, %s2031_s10  ;;  %p2037_p5 = scmp.lt.s32.totalorder %s2031_s10, %s2031_s10 }
   0xd   :  { %p2038_p6 = por %p2037_p5, %p2036_p4 }
   0xf   :  { %p2039_p7 = pnand %p2038_p6, %p2032_p3 }
  0x11   :  { %2042 = shalt.err (!%p2039_p7)
}
  0x12   :  { %s2140_s11 = smov 256   ;;  %s2141_s12 = smov 16  }
  0x13   :  { %39 = dma.hbm_to_vmem [thread:$0]  %s2302_s1, 4096, %s34_s25, [#allocation6], %s2140_s11, %s2140_s11, %s2141_s12  }
  0x14   :  { %s2142_s15 = smov [#allocation2]   ;;  %s2043_s19 = scalar_lea.hbm %s2301_s0, 128 }
  0x15   :  { %s21_s16 = sshll.u32 %s2142_s15, 4  ;;  %p2044_p8 = scmp.ne.s32.totalorder %s2301_s0, %s2043_s19  ;;  %s22_s16 = int_to_ptr.vmem [resolvable:$true] %s21_s16 }
  0x16   :  { %p2047_p9 = scmp.lt.u32.totalorder %s2043_s19, %s2301_s0 }
  0x18   :  { %p2049_p10 = pnand %p2047_p9, %p2044_p8 }
  0x1a   :  { %2052 = shalt.err (!%p2049_p10)
}
  0x1b   :  { %s2053_s24 = scalar_lea.vmem %s22_s16, 128  ;;  %p2058_p12 = scmp.lt.s32.totalorder %s22_s16, %s22_s16 }
  0x1c   :  { %p2054_p11 = scmp.ne.s32.totalorder %s22_s16, %s2053_s24  ;;  %p2059_p13 = scmp.lt.s32.totalorder %s2053_s24, %s2053_s24 }
  0x1e   :  { %p2060_p0 = por %p2059_p13, %p2058_p12 }
  0x20   :  { %p2061_p1 = pnand %p2060_p0, %p2054_p11 }
  0x22   :  { %2064 = shalt.err (!%p2061_p1)
}
  0x23   :  { %s2143_s1 = smov 64   ;;  %s2144_s25 = smov 4  }
  0x24   :  { %27 = dma.hbm_to_vmem [thread:$0]  %s2301_s0, 128, %s22_s16, [#allocation3], %s2143_s1, %s2143_s1, %s2144_s25  }
  0x25   :  { %s2145_s28 = smov [#allocation7]   ;;  %s2065_s9 = scalar_lea.hbm %s2304_s3, 12288 }
  0x26   :  { %s47_s29 = sshll.u32 %s2145_s28, 4  ;;  %p2066_p2 = scmp.ne.s32.totalorder %s2304_s3, %s2065_s9  ;;  %s48_s29 = int_to_ptr.vmem [resolvable:$true] %s47_s29 }
  0x27   :  { %p2069_p3 = scmp.lt.u32.totalorder %s2065_s9, %s2304_s3 }
  0x29   :  { %p2071_p4 = pnand %p2069_p3, %p2066_p2 }
  0x2b   :  { %2074 = shalt.err (!%p2071_p4)
}
  0x2c   :  { %s2075_s14 = scalar_lea.vmem %s48_s29, 12288  ;;  %p2080_p6 = scmp.lt.s32.totalorder %s48_s29, %s48_s29 }
  0x2d   :  { %p2076_p5 = scmp.ne.s32.totalorder %s48_s29, %s2075_s14  ;;  %p2081_p7 = scmp.lt.s32.totalorder %s2075_s14, %s2075_s14 }
  0x2f   :  { %p2082_p8 = por %p2081_p7, %p2080_p6 }
  0x31   :  { %p2083_p9 = pnand %p2082_p8, %p2076_p5 }
  0x33   :  { %2086 = shalt.err (!%p2083_p9)
}
  0x34   :  { %s2146_s0 = smov 192   ;;  %s2147_s15 = smov 12  }
  0x35   :  { %53 = dma.hbm_to_vmem [thread:$0]  %s2304_s3, 12288, %s48_s29, [#allocation6], %s2146_s0, %s2146_s0, %s2147_s15  }
  0x36   :  { %s2148_s18 = smov [#allocation8]   ;;  %s2087_s22 = scalar_lea.hbm %s2306_s5, 3072 }
  0x37   :  { %s61_s19 = sshll.u32 %s2148_s18, 4  ;;  %p2088_p10 = scmp.ne.s32.totalorder %s2306_s5, %s2087_s22  ;;  %s62_s19 = int_to_ptr.vmem [resolvable:$true] %s61_s19 }
  0x38   :  { %p2091_p11 = scmp.lt.u32.totalorder %s2087_s22, %s2306_s5 }
  0x3a   :  { %p2093_p12 = pnand %p2091_p11, %p2088_p10 }
  0x3c   :  { %2096 = shalt.err (!%p2093_p12)
}
  0x3d   :  { %s2097_s28 = scalar_lea.vmem %s62_s19, 3072  ;;  %p2102_p0 = scmp.lt.s32.totalorder %s62_s19, %s62_s19 }
  0x3e   :  { %p2098_p13 = scmp.ne.s32.totalorder %s62_s19, %s2097_s28  ;;  %p2103_p1 = scmp.lt.s32.totalorder %s2097_s28, %s2097_s28 }
  0x40   :  { %p2104_p2 = por %p2103_p1, %p2102_p0 }
  0x42   :  { %p2105_p3 = pnand %p2104_p2, %p2098_p13 }
  0x44   :  { %2108 = shalt.err (!%p2105_p3)
}
  0x45   :  { %67 = dma.hbm_to_vmem [thread:$0]  %s2306_s5, 3072, %s62_s19, [#allocation9], %s2143_s1, %s2143_s1, %s2144_s25  }
  0x46   :  { %2131 = dma.done.wait [#allocation3], 128  }
  0x47   :  { %2132 = vsyncadd [#allocation3], 4294967168 }
  0x48   :  { %2133 = dma.done.wait [#allocation6], 16384  }
  0x49   :  { %2134 = vsyncadd [#allocation6], 4294950912 }
  0x4a   :  { %2135 = dma.done.wait [#allocation9], 3072  }
  0x4b   :  { %2136 = vsyncadd [#allocation9], 4294964224  ;;  %v2149_v0 = vmov 0   ;;  %v1816_v1 = vld [vmem:[#allocation5 + $0x4] ss:$16 sps:$4 sm:$0xff]   ;;  %v1842_v29 = vld [vmem:[#allocation2] sm:$0xff]  }
  0x4c   :  { %337 = vmatprep.mubr.bf16.mxu0 %v2149_v0  ;;  %380 = vmatprep.mubr.bf16.mxu1 %v2149_v0  ;;  %v1818_v2 = vld [vmem:[#allocation5] ss:$16 sps:$4 sm:$0xff]   ;;  %v1819_v3 = vld [vmem:[#allocation5 + $0x24] ss:$16 sps:$4 sm:$0xff]   ;;  %v1840_v9 = vld [vmem:[#allocation5 + $0xc] ss:$16 sps:$4 sm:$0xff]  }
  0x4d   :  { %305 = vmatprep.subr.bf16.mxu0 %v1816_v1  ;;  %v1821_v4 = vld [vmem:[#allocation5 + $0x20] ss:$16 sps:$4 sm:$0xff]   ;;  %v1822_v5 = vld [vmem:[#allocation5 + $0x44] ss:$16 sps:$4 sm:$0xff]   ;;  %v1843_v11 = vld [vmem:[#allocation5 + $0x8] ss:$16 sps:$4 sm:$0xff]   ;;  %348 = vmatprep.subr.bf16.mxu1 %v1840_v9 }
  0x4e   :  { %306 = vmatpush1.bf16.msra.mxu0 %v1818_v2  ;;  %v1824_v6 = vld [vmem:[#allocation5 + $0x40] ss:$16 sps:$4 sm:$0xff]   ;;  %v1825_v7 = vld [vmem:[#allocation5 + $0x64] ss:$16 sps:$4 sm:$0xff]   ;;  %v1844_v12 = vld [vmem:[#allocation5 + $0x2c] ss:$16 sps:$4 sm:$0xff]   ;;  %349 = vmatpush1.bf16.msra.mxu1 %v1843_v11 }
  0x4f   :  { %307 = vmatprep.subr.bf16.mxu0 %v1819_v3  ;;  %v1827_v8 = vld [vmem:[#allocation5 + $0x60] ss:$16 sps:$4 sm:$0xff]   ;;  %v1828_v10 = vld [vmem:[#allocation5 + $0x84] ss:$16 sps:$4 sm:$0xff]   ;;  %v1846_v13 = vld [vmem:[#allocation5 + $0x28] ss:$16 sps:$4 sm:$0xff]   ;;  %350 = vmatprep.subr.bf16.mxu1 %v1844_v12 }
  0x50   :  { %v1830_v14 = vld [vmem:[#allocation5 + $0x80] ss:$16 sps:$4 sm:$0xff]   ;;  %v1847_v15 = vld [vmem:[#allocation5 + $0x4c] ss:$16 sps:$4 sm:$0xff]   ;;  %v1831_v16 = vld [vmem:[#allocation5 + $0xa4] ss:$16 sps:$4 sm:$0xff]  }
  0x51   :  { %v1849_v17 = vld [vmem:[#allocation5 + $0x48] ss:$16 sps:$4 sm:$0xff]   ;;  %v1833_v18 = vld [vmem:[#allocation5 + $0xa0] ss:$16 sps:$4 sm:$0xff]   ;;  %v1850_v19 = vld [vmem:[#allocation5 + $0x6c] ss:$16 sps:$4 sm:$0xff]  }
  0x52   :  { %308 = vmatpush1.bf16.msra.mxu0 %v1821_v4  ;;  %351 = vmatpush1.bf16.msra.mxu1 %v1846_v13  ;;  %v1834_v20 = vld [vmem:[#allocation5 + $0xc4] ss:$16 sps:$4 sm:$0xff]   ;;  %v1852_v21 = vld [vmem:[#allocation5 + $0x68] ss:$16 sps:$4 sm:$0xff]   ;;  %v1836_v22 = vld [vmem:[#allocation5 + $0xc0] ss:$16 sps:$4 sm:$0xff]  }
  0x53   :  { %309 = vmatprep.subr.bf16.mxu0 %v1822_v5  ;;  %352 = vmatprep.subr.bf16.mxu1 %v1847_v15  ;;  %v1853_v23 = vld [vmem:[#allocation5 + $0x8c] ss:$16 sps:$4 sm:$0xff]   ;;  %v1837_v24 = vld [vmem:[#allocation5 + $0xe4] ss:$16 sps:$4 sm:$0xff]   ;;  %v1855_v25 = vld [vmem:[#allocation5 + $0x88] ss:$16 sps:$4 sm:$0xff]  }
  0x54   :  { %v1839_v26 = vld [vmem:[#allocation5 + $0xe0] ss:$16 sps:$4 sm:$0xff]   ;;  %v1856_v27 = vld [vmem:[#allocation5 + $0xac] ss:$16 sps:$4 sm:$0xff]   ;;  %v1858_v30 = vld [vmem:[#allocation5 + $0xa8] ss:$16 sps:$4 sm:$0xff]  }
  0x55   :  { %v1867_v28 = vld [vmem:[#allocation7 + $0x4] ss:$12 sps:$4 sm:$0xff]   ;;  %v1859_v31 = vld [vmem:[#allocation5 + $0xcc] ss:$16 sps:$4 sm:$0xff]   ;;  %v1861_v34 = vld [vmem:[#allocation5 + $0xc8] ss:$16 sps:$4 sm:$0xff]  }
  0x56   :  { %310 = vmatpush1.bf16.msra.mxu0 %v1824_v6  ;;  %353 = vmatpush1.bf16.msra.mxu1 %v1849_v17  ;;  %v1865_v32 = vld [vmem:[#allocation7] ss:$12 sps:$4 sm:$0xff]   ;;  %v1870_v33 = vld [vmem:[#allocation7 + $0x1c] ss:$12 sps:$4 sm:$0xff]   ;;  %v1868_v36 = vld [vmem:[#allocation7 + $0x18] ss:$12 sps:$4 sm:$0xff]  }
  0x57   :  { %311 = vmatprep.subr.bf16.mxu0 %v1825_v7  ;;  %354 = vmatprep.subr.bf16.mxu1 %v1850_v19  ;;  %v1862_v35 = vld [vmem:[#allocation5 + $0xec] ss:$16 sps:$4 sm:$0xff]   ;;  %v1873_v37 = vld [vmem:[#allocation7 + $0x34] ss:$12 sps:$4 sm:$0xff]   ;;  %v1864_v38 = vld [vmem:[#allocation5 + $0xe8] ss:$16 sps:$4 sm:$0xff]  }
  0x58   :  { %v1871_v39 = vld [vmem:[#allocation7 + $0x30] ss:$12 sps:$4 sm:$0xff]   ;;  %v1892_v40 = vld [vmem:[#allocation7 + $0xc8] ss:$12 sps:$4 sm:$0xff]   ;;  %v1876_v41 = vld [vmem:[#allocation7 + $0x4c] ss:$12 sps:$4 sm:$0xff]  }
  0x59   :  { %v1874_v42 = vld [vmem:[#allocation7 + $0x48] ss:$12 sps:$4 sm:$0xff]   ;;  %v1897_v44 = vld [vmem:[#allocation7 + $0xe0] ss:$12 sps:$4 sm:$0xff]   ;;  %v1879_v45 = vld [vmem:[#allocation7 + $0x64] ss:$12 sps:$4 sm:$0xff]  }
  0x5a   :  { %312 = vmatpush1.bf16.msra.mxu0 %v1827_v8  ;;  %355 = vmatpush1.bf16.msra.mxu1 %v1852_v21  ;;  %v1893_v43 = vld [vmem:[#allocation7 + $0x8] ss:$12 sps:$4 sm:$0xff]   ;;  %v1898_v46 = vld [vmem:[#allocation7 + $0x20] ss:$12 sps:$4 sm:$0xff]   ;;  %v1902_v48 = vld [vmem:[#allocation7 + $0xf8] ss:$12 sps:$4 sm:$0xff]  }
  0x5b   :  { %313 = vmatprep.subr.bf16.mxu0 %v1828_v10  ;;  %356 = vmatprep.subr.bf16.mxu1 %v1853_v23  ;;  %v1877_v47 = vld [vmem:[#allocation7 + $0x60] ss:$12 sps:$4 sm:$0xff]   ;;  %v1882_v49 = vld [vmem:[#allocation7 + $0x7c] ss:$12 sps:$4 sm:$0xff]   ;;  %v1880_v50 = vld [vmem:[#allocation7 + $0x78] ss:$12 sps:$4 sm:$0xff]  }
  0x5c   :  { %v1885_v51 = vld [vmem:[#allocation7 + $0x94] ss:$12 sps:$4 sm:$0xff]   ;;  %v1903_v52 = vld [vmem:[#allocation7 + $0x38] ss:$12 sps:$4 sm:$0xff]   ;;  %v1907_v53 = vld [vmem:[#allocation7 + $0x110] ss:$12 sps:$4 sm:$0xff]  }
  0x5d   :  { %v1908_v54 = vld [vmem:[#allocation7 + $0x50] ss:$12 sps:$4 sm:$0xff]   ;;  %v1912_v56 = vld [vmem:[#allocation7 + $0x128] ss:$12 sps:$4 sm:$0xff]   ;;  %v1888_v57 = vld [vmem:[#allocation7 + $0xac] ss:$12 sps:$4 sm:$0xff]  }
  0x5e   :  { %314 = vmatpush1.bf16.msra.mxu0 %v1830_v14  ;;  %357 = vmatpush1.bf16.msra.mxu1 %v1855_v25  ;;  %v1883_v55 = vld [vmem:[#allocation7 + $0x90] ss:$12 sps:$4 sm:$0xff]   ;;  %v1913_v58 = vld [vmem:[#allocation7 + $0x68] ss:$12 sps:$4 sm:$0xff]   ;;  %v1917_v60 = vld [vmem:[#allocation7 + $0x140] ss:$12 sps:$4 sm:$0xff]  }
  0x5f   :  { %315 = vmatprep.subr.bf16.mxu0 %v1831_v16  ;;  %358 = vmatprep.subr.bf16.mxu1 %v1856_v27  ;;  %v1886_v59 = vld [vmem:[#allocation7 + $0xa8] ss:$12 sps:$4 sm:$0xff]   ;;  %v1891_v61 = vld [vmem:[#allocation7 + $0xc4] ss:$12 sps:$4 sm:$0xff]   ;;  %v1918_v62 = vld [vmem:[#allocation7 + $0x80] ss:$12 sps:$4 sm:$0xff]  }
  0x60   :  { %v1889_v63 = vld [vmem:[#allocation7 + $0xc0] ss:$12 sps:$4 sm:$0xff]   ;;  %v1896_v0 = vld [vmem:[#allocation7 + $0xdc] ss:$12 sps:$4 sm:$0xff]   ;;  %v1894_v1 = vld [vmem:[#allocation7 + $0xd8] ss:$12 sps:$4 sm:$0xff]  }
  0x61   :  { %v1901_v2 = vld [vmem:[#allocation7 + $0xf4] ss:$12 sps:$4 sm:$0xff]   ;;  %v1899_v3 = vld [vmem:[#allocation7 + $0xf0] ss:$12 sps:$4 sm:$0xff]   ;;  %v1906_v4 = vld [vmem:[#allocation7 + $0x10c] ss:$12 sps:$4 sm:$0xff]  }
  0x62   :  { %316 = vmatpush1.bf16.msra.mxu0 %v1833_v18  ;;  %359 = vmatpush1.bf16.msra.mxu1 %v1858_v30  ;;  %v1904_v5 = vld [vmem:[#allocation7 + $0x108] ss:$12 sps:$4 sm:$0xff]   ;;  %v1911_v6 = vld [vmem:[#allocation7 + $0x124] ss:$12 sps:$4 sm:$0xff]   ;;  %v1909_v7 = vld [vmem:[#allocation7 + $0x120] ss:$12 sps:$4 sm:$0xff]  }
  0x63   :  { %317 = vmatprep.subr.bf16.mxu0 %v1834_v20  ;;  %360 = vmatprep.subr.bf16.mxu1 %v1859_v31  ;;  %v1916_v8 = vld [vmem:[#allocation7 + $0x13c] ss:$12 sps:$4 sm:$0xff]   ;;  %v1914_v9 = vld [vmem:[#allocation7 + $0x138] ss:$12 sps:$4 sm:$0xff]   ;;  %v1921_v10 = vld [vmem:[#allocation7 + $0x154] ss:$12 sps:$4 sm:$0xff]   ;;  %v119_v20 = vlaneseq }
  0x64   :  { %v1922_v11 = vld [vmem:[#allocation7 + $0x158] ss:$12 sps:$4 sm:$0xff]   ;;  %v1919_v12 = vld [vmem:[#allocation7 + $0x150] ss:$12 sps:$4 sm:$0xff]   ;;  %v1924_v16 = vld [vmem:[#allocation7 + $0x168] ss:$12 sps:$4 sm:$0xff]  }
  0x65   :  { %v1923_v13 = vld [vmem:[#allocation7 + $0x98] ss:$12 sps:$4 sm:$0xff]   ;;  %v1927_v15 = vld [vmem:[#allocation7 + $0x170] ss:$12 sps:$4 sm:$0xff]   ;;  %v1932_v19 = vld [vmem:[#allocation7 + $0x248] ss:$12 sps:$4 sm:$0xff]  }
  0x66   :  { %318 = vmatpush1.bf16.msra.mxu0 %v1836_v22  ;;  %361 = vmatpush1.bf16.msra.mxu1 %v1861_v34  ;;  %v1926_v14 = vld [vmem:[#allocation7 + $0x16c] ss:$12 sps:$4 sm:$0xff]   ;;  %v1928_v17 = vld [vmem:[#allocation7 + $0xb0] ss:$12 sps:$4 sm:$0xff]   ;;  %v2249_v21 = vshrl.u32 %v119_v20, 7  ;;  %vm2151_vm0 = vmmov 0  }
  0x67   :  { %319 = vmatprep.subr.bf16.mxu0 %v1837_v24  ;;  %362 = vmatprep.subr.bf16.mxu1 %v1862_v35  ;;  %v1931_v18 = vld [vmem:[#allocation7 + $0x184] ss:$12 sps:$4 sm:$0xff]   ;;  %v117_v23 = vld [vmem:[%s2303_s2] sm:$0xf]  ;;  %s2152_s8 = smov [#allocation10]  }
  0x68   :  { %v121_v22 = vsub.s32 0, %v2249_v21  ;;  %v125_v24 = vsub.s32 1, %v2249_v21  ;;  %v129_v35 = vsub.s32 2, %v2249_v21  ;;  %v1963_v20 = vld [vmem:[#allocation7 + $0x218] ss:$12 sps:$4 sm:$0xff]   ;;  %s1529_s9 = sshll.u32 %s2152_s8, 4  ;;  %s1530_s9 = int_to_ptr.vmem [resolvable:$true] %s1529_s9 }
  0x69   :  { %p2114_p5 = scmp.lt.s32.totalorder %s1530_s9, %s1530_s9 }
  0x6a   :  { %320 = vmatpush1.bf16.msra.mxu0 %v1839_v26  ;;  %363 = vmatpush1.bf16.msra.mxu1 %v1864_v38  ;;  %v122_v25 = vrot.slane %v117_v23, %v121_v22  ;;  %v126_v26 = vrot.slane %v117_v23, %v125_v24  ;;  %v133_v38 = vsub.s32 3, %v2249_v21  ;;  %v2010_v21 = vld [vmem:[#allocation8 + $0x88] sm:$0xff]  }
  0x6b   :  { %1060 = vmatprep.subr.bf16.mxu0 %v1867_v28  ;;  %1697 = vmatprep.subr.bf16.mxu1 %v1892_v40 }
  0x6d   :  { %338 = vmatmul.mubr.bf16.vlgmr.msra.gmra.mrb[0].mxu0 %v1842_v29  ;;  %381 = vmatmul.mubr.bf16.vlgmr.msra.gmra.mrb[0].mxu1 %v1842_v29 }
  0x6e   :  { %1061 = vmatpush1.bf16.msra.mxu0 %v1865_v32  ;;  %1698 = vmatpush3.bf16.msra.mxu1 %v1893_v43  ;;  %v1929_v43 = vld [vmem:[#allocation7 + $0x180] ss:$12 sps:$4 sm:$0xff]  }
  0x6f   :  { %1062 = vmatprep.subr.bf16.mxu0 %v1870_v33  ;;  %1699 = vmatprep.subr.bf16.mxu1 %v1897_v44  ;;  %v1933_v44 = vld [vmem:[#allocation7 + $0x188] ss:$12 sps:$4 sm:$0xff]  }
  0x72   :  { %1063 = vmatpush1.bf16.msra.mxu0 %v1868_v36  ;;  %1700 = vmatpush3.bf16.msra.mxu1 %v1898_v46  ;;  %v1936_v46 = vld [vmem:[#allocation7 + $0x19c] ss:$12 sps:$4 sm:$0xff]  }
  0x73   :  { %1064 = vmatprep.subr.bf16.mxu0 %v1873_v37  ;;  %1701 = vmatprep.subr.bf16.mxu1 %v1902_v48  ;;  %v134_v48 = vrot.slane %v117_v23, %v133_v38  ;;  %v1981_v38 = vld [vmem:[#allocation7 + $0x2a0] ss:$12 sps:$4 sm:$0xff]  }
  0x76   :  { %1065 = vmatpush1.bf16.msra.mxu0 %v1871_v39  ;;  %1702 = vmatpush3.bf16.msra.mxu1 %v1903_v52 }
  0x77   :  { %1066 = vmatprep.subr.bf16.mxu0 %v1876_v41  ;;  %1703 = vmatprep.subr.bf16.mxu1 %v1907_v53 }
  0x7a   :  { %1067 = vmatpush1.bf16.msra.mxu0 %v1874_v42  ;;  %1704 = vmatpush3.bf16.msra.mxu1 %v1908_v54  ;;  %v1941_v54 = vld [vmem:[#allocation7 + $0x1b4] ss:$12 sps:$4 sm:$0xff]  }
  0x7b   :  { %1068 = vmatprep.subr.bf16.mxu0 %v1879_v45  ;;  %1705 = vmatprep.subr.bf16.mxu1 %v1912_v56  ;;  %v130_v45 = vrot.slane %v117_v23, %v129_v35  ;;  %v1966_v23 = vld [vmem:[#allocation7 + $0x22c] ss:$12 sps:$4 sm:$0xff]  }
  0x7e   :  { %1069 = vmatpush1.bf16.msra.mxu0 %v1877_v47  ;;  %1706 = vmatpush3.bf16.msra.mxu1 %v1913_v58  ;;  %v1937_v47 = vld [vmem:[#allocation7 + $0x260] ss:$12 sps:$4 sm:$0xff]  }
  0x7f   :  { %1070 = vmatprep.subr.bf16.mxu0 %v1882_v49  ;;  %1707 = vmatprep.subr.bf16.mxu1 %v1917_v60 }
  0x82   :  { %1071 = vmatpush1.bf16.msra.mxu0 %v1880_v50  ;;  %1708 = vmatpush3.bf16.msra.mxu1 %v1918_v62  ;;  %v1934_v50 = vld [vmem:[#allocation7 + $0x198] ss:$12 sps:$4 sm:$0xff]  }
  0x83   :  { %1072 = vmatprep.subr.bf16.mxu0 %v1885_v51  ;;  %1709 = vmatprep.subr.bf16.mxu1 %v1922_v11  ;;  %v1938_v51 = vld [vmem:[#allocation7 + $0x1a0] ss:$12 sps:$4 sm:$0xff]  }
  0x84   :  { %v1949_v11 = vld [vmem:[#allocation7 + $0x1e0] ss:$12 sps:$4 sm:$0xff]  }
  0x86   :  { %1073 = vmatpush1.bf16.msra.mxu0 %v1883_v55  ;;  %1710 = vmatpush3.bf16.msra.mxu1 %v1923_v13  ;;  %v1942_v55 = vld [vmem:[#allocation7 + $0x278] ss:$12 sps:$4 sm:$0xff]   ;;  %v1956_v13 = vld [vmem:[#allocation7 + $0x1fc] ss:$12 sps:$4 sm:$0xff]  }
  0x87   :  { %1074 = vmatprep.subr.bf16.mxu0 %v1888_v57  ;;  %1711 = vmatprep.subr.bf16.mxu1 %v1927_v15  ;;  %v1954_v15 = vld [vmem:[#allocation7 + $0x1f8] ss:$12 sps:$4 sm:$0xff]  }
  0x8a   :  { %1075 = vmatpush1.bf16.msra.mxu0 %v1886_v59  ;;  %1712 = vmatpush3.bf16.msra.mxu1 %v1928_v17  ;;  %v1961_v17 = vld [vmem:[#allocation7 + $0x214] ss:$12 sps:$4 sm:$0xff]  }
  0x8b   :  { %1076 = vmatprep.subr.bf16.mxu0 %v1891_v61  ;;  %1719 = vmatprep.subr.bf16.mxu1 %v1932_v19  ;;  %v1959_v19 = vld [vmem:[#allocation7 + $0x210] ss:$12 sps:$4 sm:$0xff]  }
  0x8e   :  { %1077 = vmatpush1.bf16.msra.mxu0 %v1889_v63  ;;  %v1939_v63 = vld [vmem:[#allocation7 + $0x1b0] ss:$12 sps:$4 sm:$0xff]  }
  0x8f   :  { %1078 = vmatprep.subr.bf16.mxu0 %v1896_v0  ;;  %v1943_v0 = vld [vmem:[#allocation7 + $0x1b8] ss:$12 sps:$4 sm:$0xff]  }
  0x92   :  { %1079 = vmatpush1.bf16.msra.mxu0 %v1894_v1 }
  0x93   :  { %1080 = vmatprep.subr.bf16.mxu0 %v1901_v2  ;;  %v1946_v2 = vld [vmem:[#allocation7 + $0x1cc] ss:$12 sps:$4 sm:$0xff]  }
  0x96   :  { %1081 = vmatpush1.bf16.msra.mxu0 %v1899_v3  ;;  %v1947_v3 = vld [vmem:[#allocation7 + $0x290] ss:$12 sps:$4 sm:$0xff]  }
  0x97   :  { %1082 = vmatprep.subr.bf16.mxu0 %v1906_v4 }
  0x9a   :  { %1083 = vmatpush1.bf16.msra.mxu0 %v1904_v5 }
  0x9b   :  { %1084 = vmatprep.subr.bf16.mxu0 %v1911_v6 }
  0x9e   :  { %1085 = vmatpush1.bf16.msra.mxu0 %v1909_v7  ;;  %v1944_v7 = vld [vmem:[#allocation7 + $0x1c8] ss:$12 sps:$4 sm:$0xff]  }
  0x9f   :  { %1086 = vmatprep.subr.bf16.mxu0 %v1916_v8  ;;  %v1948_v8 = vld [vmem:[#allocation7 + $0x1d0] ss:$12 sps:$4 sm:$0xff]  }
  0xa2   :  { %1087 = vmatpush1.bf16.msra.mxu0 %v1914_v9  ;;  %v1951_v9 = vld [vmem:[#allocation7 + $0x1e4] ss:$12 sps:$4 sm:$0xff]  }
  0xa3   :  { %1088 = vmatprep.subr.bf16.mxu0 %v1921_v10  ;;  %v1952_v10 = vld [vmem:[#allocation7 + $0x2a8] ss:$12 sps:$4 sm:$0xff]  }
  0xa6   :  { %1089 = vmatpush1.bf16.msra.mxu0 %v1919_v12  ;;  %v1953_v12 = vld [vmem:[#allocation7 + $0x1e8] ss:$12 sps:$4 sm:$0xff]  }
  0xa7   :  { %1090 = vmatprep.subr.bf16.mxu0 %v1926_v14  ;;  %v1957_v14 = vld [vmem:[#allocation7 + $0x2c0] ss:$12 sps:$4 sm:$0xff]  }
  0xaa   :  { %1091 = vmatpush1.bf16.msra.mxu0 %v1924_v16  ;;  %v1958_v16 = vld [vmem:[#allocation7 + $0x200] ss:$12 sps:$4 sm:$0xff]  }
  0xab   :  { %1103 = vmatprep.subr.bf16.mxu0 %v1931_v18  ;;  %v1962_v18 = vld [vmem:[#allocation7 + $0x2d8] ss:$12 sps:$4 sm:$0xff]  }
 0x140   :  { %v339_v27 = vpop.f32.mrb[0].mxu0  ;;  %v382_v49 = vpop.f32.mrb[0].mxu1 }
 0x141   :  { %v340_v28 = vadd.f32 %v339_v27, %v122_v25  ;;  %v341_v29 = vpop.f32.mrb[1].mxu0  ;;  %v383_v52 = vadd.f32 %v382_v49, %v130_v45  ;;  %v384_v53 = vpop.f32.mrb[1].mxu1  ;;  %v1968_v27 = vld [vmem:[#allocation7 + $0x230] ss:$12 sps:$4 sm:$0xff]  }
 0x142   :  { %v342_v30 = vadd.f32 %v341_v29, %v126_v26  ;;  %v343_v31 = vpop.f32.mrb[2].mxu0  ;;  %v385_v56 = vadd.f32 %v384_v53, %v134_v48  ;;  %v386_v57 = vpop.f32.mrb[2].mxu1  ;;  %v1969_v29 = vld [vmem:[#allocation7 + $0x240] ss:$12 sps:$4 sm:$0xff]   ;;  %v1997_v49 = vld [vmem:[#allocation8 + $0x50] sm:$0xff]  }
 0x143   :  { %v344_v32 = vadd.f32 %v343_v31, %v122_v25  ;;  %v345_v33 = vpop.f32.mrb[3].mxu0  ;;  %v391_v36 = vmax.f32 %v340_v28, 0.0  ;;  %v393_v58 = vmax.f32 %v383_v52, 0.0  ;;  %v387_v59 = vadd.f32 %v386_v57, %v130_v45  ;;  %v388_v60 = vpop.f32.mrb[3].mxu1  ;;  %v1967_v25 = vld [vmem:[#allocation7 + $0x2f0] ss:$12 sps:$4 sm:$0xff]  }
 0x144   :  { %v346_v34 = vadd.f32 %v345_v33, %v126_v26  ;;  %v392_v39 = vmax.f32 %v342_v30, 0.0  ;;  %v394_v61 = vmax.f32 %v385_v56, 0.0  ;;  %v389_v62 = vadd.f32 %v388_v60, %v134_v48  ;;  %v1964_v26 = vld [vmem:[#allocation7 + $0x228] ss:$12 sps:$4 sm:$0xff]   ;;  %v1971_v28 = vld [vmem:[#allocation7 + $0x244] ss:$12 sps:$4 sm:$0xff]  }
 0x145   :  { %v395_v37 = vmax.f32 %v344_v32, 0.0  ;;  %v397_v1 = vmax.f32 %v387_v59, 0.0  ;;  %v1974_v30 = vld [vmem:[#allocation7 + $0x25c] ss:$12 sps:$4 sm:$0xff]   ;;  %v1972_v31 = vld [vmem:[#allocation7 + $0x258] ss:$12 sps:$4 sm:$0xff]  }
 0x146   :  { %v396_v40 = vmax.f32 %v346_v34, 0.0  ;;  %v398_v4 = vmax.f32 %v389_v62, 0.0  ;;  %v1977_v32 = vld [vmem:[#allocation7 + $0x274] ss:$12 sps:$4 sm:$0xff]   ;;  %v1975_v33 = vld [vmem:[#allocation7 + $0x270] ss:$12 sps:$4 sm:$0xff]  }
 0x147   :  { %v399_v41 = vpack.c.bf16 %v395_v37, %v391_v36  ;;  %v2264_v5 = vpack.c.bf16 %v397_v1, %v393_v58  ;;  %v1980_v34 = vld [vmem:[#allocation7 + $0x28c] ss:$12 sps:$4 sm:$0xff]   ;;  %v1978_v36 = vld [vmem:[#allocation7 + $0x288] ss:$12 sps:$4 sm:$0xff]   ;;  %v1983_v37 = vld [vmem:[#allocation7 + $0x2a4] ss:$12 sps:$4 sm:$0xff]  }
 0x148   :  { %v400_v42 = vpack.c.bf16 %v396_v40, %v392_v39  ;;  %v402_v6 = vpack.c.bf16 %v398_v4, %v394_v61  ;;  %v1986_v39 = vld [vmem:[#allocation7 + $0x2bc] ss:$12 sps:$4 sm:$0xff]   ;;  %v1984_v40 = vld [vmem:[#allocation7 + $0x2b8] ss:$12 sps:$4 sm:$0xff]   ;;  %v2005_v57 = vld [vmem:[#allocation8 + $0x70] sm:$0xff]   ;;  %v2150_v61 = vmov 0.0  }
 0x149   :  { %v1993_v45 = vld [vmem:[#allocation8 + $0x40] sm:$0xff]   ;;  %v1996_v48 = vld [vmem:[#allocation8 + $0x8] sm:$0xff]   ;;  %v2000_v52 = vld [vmem:[#allocation8 + $0x18] sm:$0xff]  }
 0x14a   :  { %1092 = vmatprep.mubr.bf16.mxu0 %v400_v42  ;;  %1178 = vmatprep.mubr.bf16.mxu1 %v400_v42  ;;  %v1987_v42 = vld [vmem:[#allocation7 + $0x2d0] ss:$12 sps:$4 sm:$0xff]   ;;  %v2001_v53 = vld [vmem:[#allocation8 + $0x60] sm:$0xff]   ;;  %v2004_v56 = vld [vmem:[#allocation8 + $0x28] sm:$0xff]  }
 0x14b   :  { %1093 = vmatmul.mubr.bf16.vlgmr.msra.gmra.mrb[4].mxu0 %v399_v41  ;;  %1179 = vmatmul.mubr.bf16.vlgmr.msra.gmra.mrb[4].mxu1 %v399_v41  ;;  %v1989_v41 = vld [vmem:[#allocation7 + $0x2d4] ss:$12 sps:$4 sm:$0xff]   ;;  %v2007_v59 = vld [vmem:[#allocation8 + $0x78] sm:$0xff]  }
 0x14c   :  { %1104 = vmatpush1.bf16.msra.mxu0 %v1929_v43  ;;  %1720 = vmatpush3.bf16.msra.mxu1 %v1933_v44  ;;  %v1992_v43 = vld [vmem:[#allocation7 + $0x2ec] ss:$12 sps:$4 sm:$0xff]   ;;  %v1990_v44 = vld [vmem:[#allocation7 + $0x2e8] ss:$12 sps:$4 sm:$0xff]  }
 0x14d   :  { %1105 = vmatprep.subr.bf16.mxu0 %v1936_v46  ;;  %1721 = vmatprep.subr.bf16.mxu1 %v1937_v47  ;;  %v1994_v46 = vld [vmem:[#allocation8] sm:$0xff]   ;;  %v1995_v47 = vld [vmem:[#allocation8 + $0x48] sm:$0xff]   ;;  %v2006_v58 = vld [vmem:[#allocation8 + $0x30] sm:$0xff]  }
 0x14e   :  { %1219 = vmatprep.mubr.bf16.mxu1 %v402_v6  ;;  %1135 = vmatprep.mubr.bf16.mxu0 %v402_v6  ;;  %v2008_v60 = vld [vmem:[#allocation8 + $0x38] sm:$0xff]  }
 0x14f   :  { %v531_v4 = vld [vmem:[%s2305_s4] sm:$0x7] }
 0x150   :  { %1106 = vmatpush1.bf16.msra.mxu0 %v1934_v50  ;;  %1722 = vmatpush3.bf16.msra.mxu1 %v1938_v51  ;;  %v1998_v50 = vld [vmem:[#allocation8 + $0x10] sm:$0xff]   ;;  %v1999_v51 = vld [vmem:[#allocation8 + $0x58] sm:$0xff]  }
 0x151   :  { %1107 = vmatprep.subr.bf16.mxu0 %v1941_v54  ;;  %1723 = vmatprep.subr.bf16.mxu1 %v1942_v55  ;;  %v2002_v54 = vld [vmem:[#allocation8 + $0x20] sm:$0xff]   ;;  %v2003_v55 = vld [vmem:[#allocation8 + $0x68] sm:$0xff]  }
 0x154   :  { %1108 = vmatpush1.bf16.msra.mxu0 %v1939_v63  ;;  %1724 = vmatpush3.bf16.msra.mxu1 %v1943_v0 }
 0x155   :  { %1109 = vmatprep.subr.bf16.mxu0 %v1946_v2  ;;  %1725 = vmatprep.subr.bf16.mxu1 %v1947_v3 }
 0x158   :  { %1110 = vmatpush1.bf16.msra.mxu0 %v1944_v7  ;;  %1726 = vmatpush3.bf16.msra.mxu1 %v1948_v8 }
 0x159   :  { %1111 = vmatprep.subr.bf16.mxu0 %v1951_v9  ;;  %1727 = vmatprep.subr.bf16.mxu1 %v1952_v10 }
 0x15c   :  { %1112 = vmatpush1.bf16.msra.mxu0 %v1949_v11  ;;  %1728 = vmatpush3.bf16.msra.mxu1 %v1953_v12 }
 0x15d   :  { %1113 = vmatprep.subr.bf16.mxu0 %v1956_v13  ;;  %1729 = vmatprep.subr.bf16.mxu1 %v1957_v14 }
 0x160   :  { %1114 = vmatpush1.bf16.msra.mxu0 %v1954_v15  ;;  %1730 = vmatpush3.bf16.msra.mxu1 %v1958_v16 }
 0x161   :  { %1115 = vmatprep.subr.bf16.mxu0 %v1961_v17  ;;  %1731 = vmatprep.subr.bf16.mxu1 %v1962_v18 }
 0x164   :  { %1116 = vmatpush1.bf16.msra.mxu0 %v1959_v19  ;;  %1732 = vmatpush3.bf16.msra.mxu1 %v1963_v20  ;;  %v536_v19 = vrot.slane %v531_v4, %v121_v22  ;;  %v540_v20 = vrot.slane %v531_v4, %v125_v24  ;;  %v2011_v22 = vld [vmem:[#allocation8 + $0x90] sm:$0xff]   ;;  %v2012_v24 = vld [vmem:[#allocation8 + $0x98] sm:$0xff]  }
 0x165   :  { %1117 = vmatprep.subr.bf16.mxu0 %v1966_v23  ;;  %1733 = vmatprep.subr.bf16.mxu1 %v1967_v25 }
 0x168   :  { %1118 = vmatpush1.bf16.msra.mxu0 %v1964_v26  ;;  %1734 = vmatpush3.bf16.msra.mxu1 %v1968_v27 }
 0x169   :  { %1119 = vmatprep.subr.bf16.mxu0 %v1971_v28  ;;  %1741 = vmatprep.subr.bf16.mxu1 %v1993_v45 }
 0x16b   :  { %1220 = vmatmul.mubr.bf16.vlgmr.msra.gmra.mrb[8].mxu1 %v2264_v5 }
 0x16c   :  { %1120 = vmatpush1.bf16.msra.mxu0 %v1969_v29  ;;  %1742 = vmatpush3.bf16.msra.mxu1 %v1994_v46 }
 0x16d   :  { %1121 = vmatprep.subr.bf16.mxu0 %v1974_v30  ;;  %1743 = vmatprep.subr.bf16.mxu1 %v1995_v47 }
 0x170   :  { %1122 = vmatpush1.bf16.msra.mxu0 %v1972_v31  ;;  %1744 = vmatpush3.bf16.msra.mxu1 %v1996_v48 }
 0x171   :  { %1123 = vmatprep.subr.bf16.mxu0 %v1977_v32  ;;  %1745 = vmatprep.subr.bf16.mxu1 %v1997_v49  ;;  %v1672_v49 = vld [vmem:[%s2307_s6] ss:$0 sm:$0xff]  ;;  %s2109_s6 = scalar_lea.vmem %s1530_s9, 256 }
 0x172   :  { %p2110_p4 = scmp.ne.s32.totalorder %s1530_s9, %s2109_s6  ;;  %p2115_p6 = scmp.lt.s32.totalorder %s2109_s6, %s2109_s6 }
 0x174   :  { %1124 = vmatpush1.bf16.msra.mxu0 %v1975_v33  ;;  %1746 = vmatpush3.bf16.msra.mxu1 %v1998_v50  ;;  %p2116_p7 = por %p2115_p6, %p2114_p5 }
 0x175   :  { %1125 = vmatprep.subr.bf16.mxu0 %v1980_v34  ;;  %1747 = vmatprep.subr.bf16.mxu1 %v1999_v51 }
 0x176   :  { %p2117_p8 = pnand %p2116_p7, %p2110_p4 }
 0x178   :  { %1126 = vmatpush1.bf16.msra.mxu0 %v1978_v36  ;;  %1748 = vmatpush3.bf16.msra.mxu1 %v2000_v52 }
 0x179   :  { %1127 = vmatprep.subr.bf16.mxu0 %v1983_v37  ;;  %1749 = vmatprep.subr.bf16.mxu1 %v2001_v53 }
 0x17c   :  { %1128 = vmatpush1.bf16.msra.mxu0 %v1981_v38  ;;  %1750 = vmatpush3.bf16.msra.mxu1 %v2002_v54  ;;  %v2009_v38 = vld [vmem:[#allocation8 + $0x80] sm:$0xff]  }
 0x17d   :  { %1129 = vmatprep.subr.bf16.mxu0 %v1986_v39  ;;  %1751 = vmatprep.subr.bf16.mxu1 %v2003_v55  ;;  %v2013_v39 = vld [vmem:[#allocation8 + $0xa0] sm:$0xff]  }
 0x180   :  { %1130 = vmatpush1.bf16.msra.mxu0 %v1984_v40  ;;  %1752 = vmatpush3.bf16.msra.mxu1 %v2004_v56  ;;  %v2014_v40 = vld [vmem:[#allocation8 + $0xa8] sm:$0xff]  }
 0x181   :  { %1131 = vmatprep.subr.bf16.mxu0 %v1989_v41  ;;  %1753 = vmatprep.subr.bf16.mxu1 %v2005_v57  ;;  %v2015_v41 = vld [vmem:[#allocation8 + $0xb0] sm:$0xff]  }
 0x184   :  { %1132 = vmatpush1.bf16.msra.mxu0 %v1987_v42  ;;  %1754 = vmatpush3.bf16.msra.mxu1 %v2006_v58  ;;  %v2016_v42 = vld [vmem:[#allocation8 + $0xb8] sm:$0xff]  }
 0x185   :  { %1133 = vmatprep.subr.bf16.mxu0 %v1992_v43  ;;  %1755 = vmatprep.subr.bf16.mxu1 %v2007_v59 }
 0x188   :  { %1134 = vmatpush1.bf16.msra.mxu0 %v1990_v44  ;;  %1756 = vmatpush3.bf16.msra.mxu1 %v2008_v60 }
 0x189   :  { %1772 = vmatprep.subr.bf16.mxu1 %v2150_v61 }
 0x18b   :  { %1136 = vmatmul.mubr.bf16.vlgmr.msra.gmra.mrb[4].mxu0 %v2264_v5  ;;  %v544_v5 = vrot.slane %v531_v4, %v129_v35 }
 0x21e   :  { %v1713_v62 = vpop.f32.mrb[4].mxu1 }
 0x21f   :  { %v1714_v63 = vpop.f32.mrb[5].mxu1 }
 0x220   :  { %v1715_v0 = vadd.f32 %v1714_v63, %v1713_v62  ;;  %v1716_v1 = vpop.f32.mrb[6].mxu1 }
 0x221   :  { %v1717_v2 = vpop.f32.mrb[7].mxu1 }
 0x222   :  { %v1718_v3 = vadd.f32 %v1717_v2, %v1716_v1  ;;  %v1181_v8 = vadd.f32 %v1715_v0, %v544_v5 }
 0x224   :  { %v1184_v12 = vadd.f32 %v1718_v3, %v544_v5 }
 0x23e   :  { %v1735_v6 = vpop.f32.mrb[8].mxu1 }
 0x23f   :  { %v1736_v7 = vpop.f32.mrb[9].mxu1 }
 0x240   :  { %v1737_v9 = vadd.f32 %v1736_v7, %v1735_v6  ;;  %v1738_v10 = vpop.f32.mrb[10].mxu1 }
 0x241   :  { %v1739_v11 = vpop.f32.mrb[11].mxu1 }
 0x242   :  { %v1222_v13 = vadd.f32 %v1737_v9, %v1181_v8  ;;  %v1740_v14 = vadd.f32 %v1739_v11, %v1738_v10 }
 0x244   :  { %v1225_v15 = vadd.f32 %v1740_v14, %v1184_v12  ;;  %v1230_v16 = vmax.f32 %v1222_v13, 0.0 }
 0x246   :  { %v1233_v17 = vmax.f32 %v1225_v15, 0.0 }
 0x248   :  { %v1236_v18 = vpack.c.bf16 %v1233_v17, %v1230_v16 }
 0x25e   :  { %v1137_v35 = vpop.f32.mrb[4].mxu0 }
 0x25f   :  { %v1792_v23 = vadd.f32 %v1137_v35, %v536_v19  ;;  %v1139_v25 = vpop.f32.mrb[5].mxu0 }
 0x260   :  { %v1793_v26 = vadd.f32 %v1139_v25, %v540_v20  ;;  %v1141_v27 = vpop.f32.mrb[6].mxu0 }
 0x261   :  { %v1794_v28 = vadd.f32 %v1141_v27, %v536_v19  ;;  %v1143_v29 = vpop.f32.mrb[7].mxu0  ;;  %v1228_v31 = vmax.f32 %v1792_v23, 0.0 }
 0x262   :  { %v1795_v30 = vadd.f32 %v1143_v29, %v540_v20  ;;  %v1229_v33 = vmax.f32 %v1793_v26, 0.0 }
 0x263   :  { %v1231_v32 = vmax.f32 %v1794_v28, 0.0 }
 0x264   :  { %v1232_v34 = vmax.f32 %v1795_v30, 0.0 }
 0x265   :  { %v1234_v36 = vpack.c.bf16 %v1231_v32, %v1228_v31 }
 0x266   :  { %v1235_v37 = vpack.c.bf16 %v1232_v34, %v1229_v33 }
 0x268   :  { %1468 = vmatprep.mubr.bf16.mxu1 %v1235_v37 }
 0x269   :  { %1469 = vmatmul.mubr.bf16.vlgmr.msra.gmra.mrb[12].mxu1 %v1234_v36 }
 0x26a   :  { %1773 = vmatpush3.bf16.msra.mxu1 %v2009_v38  ;;  %1788 = vmatprep.mubr.msk.bf16.mxu1 %vm2151_vm0, %v2150_v61 }
 0x26b   :  { %1774 = vmatprep.subr.bf16.mxu1 %v2150_v61 }
 0x26e   :  { %1775 = vmatpush3.bf16.msra.mxu1 %v2010_v21 }
 0x26f   :  { %1776 = vmatprep.subr.bf16.mxu1 %v2150_v61 }
 0x272   :  { %1777 = vmatpush3.bf16.msra.mxu1 %v2011_v22 }
 0x273   :  { %1778 = vmatprep.subr.bf16.mxu1 %v2150_v61 }
 0x276   :  { %1779 = vmatpush3.bf16.msra.mxu1 %v2012_v24 }
 0x277   :  { %1780 = vmatprep.subr.bf16.mxu1 %v2150_v61 }
 0x27a   :  { %1781 = vmatpush3.bf16.msra.mxu1 %v2013_v39 }
 0x27b   :  { %1782 = vmatprep.subr.bf16.mxu1 %v2150_v61 }
 0x27e   :  { %1783 = vmatpush3.bf16.msra.mxu1 %v2014_v40 }
 0x27f   :  { %1784 = vmatprep.subr.bf16.mxu1 %v2150_v61 }
 0x282   :  { %1785 = vmatpush3.bf16.msra.mxu1 %v2015_v41 }
 0x283   :  { %1786 = vmatprep.subr.bf16.mxu1 %v2150_v61 }
 0x286   :  { %1787 = vmatpush3.bf16.msra.mxu1 %v2016_v42 }
 0x289   :  { %1789 = vmatmul.mubr.bf16.vlgmr.msra.gmra.mrb[16].mxu1 %v1236_v18 }
 0x33c   :  { %v1757_v43 = vpop.f32.mrb[12].mxu1 }
 0x33d   :  { %v1758_v44 = vpop.f32.mrb[13].mxu1 }
 0x33e   :  { %v1759_v45 = vadd.f32 %v1758_v44, %v1757_v43  ;;  %v1760_v46 = vpop.f32.mrb[14].mxu1 }
 0x33f   :  { %v1761_v47 = vpop.f32.mrb[15].mxu1 }
 0x340   :  { %v1762_v48 = vadd.f32 %v1761_v47, %v1760_v46  ;;  %v1471_v50 = vadd.f32 %v1759_v45, %v1672_v49 }
 0x342   :  { %v1474_v54 = vadd.f32 %v1762_v48, %v1672_v49 }
 0x35c   :  { %v1511_v51 = vpop.f32.mrb[16].mxu1 }
 0x35d   :  { %v1512_v52 = vadd.f32 %v1511_v51, %v1471_v50  ;;  %v1790_v53 = vpop.f32.mrb[17].mxu1 }
 0x35e   :  { %v1514_v55 = vpop.f32.mrb[18].mxu1 }
 0x35f   :  { %2017 = vtanh.f32 %v1512_v52  ;;  %v1515_v56 = vadd.f32 %v1514_v55, %v1474_v54  ;;  %v1791_v57 = vpop.f32.mrb[19].mxu1 }
 0x361   :  { %2019 = vtanh.f32 %v1515_v56 }
 0x369   :  { %v2018_v58 = vpop.eup %2017 }
 0x36a   :  { %v1520_v59 = vmul.f32 2.0, %v2018_v58 }
 0x36b   :  { %v2020_v60 = vpop.eup %2019 }
 0x36c   :  { %1522 = vst [vmem:[#allocation10] sm:$0xff] %v1520_v59  ;;  %v1521_v61 = vmul.f32 2.0, %v2020_v60 }
 0x36e   :  { %1523 = vst [vmem:[#allocation10 + $0x8] sm:$0xff] %v1521_v61 }
 0x36f   :  { %2120 = shalt.err (!%p2117_p8)
}
 0x370   :  { %s2121_s12 = scalar_lea.hbm %s2308_s7, 256 }
 0x371   :  { %p2122_p9 = scmp.ne.s32.totalorder %s2308_s7, %s2121_s12  ;;  %p2125_p10 = scmp.lt.u32.totalorder %s2121_s12, %s2308_s7 }
 0x373   :  { %p2127_p11 = pnand %p2125_p10, %p2122_p9 }
 0x375   :  { %2130 = shalt.err (!%p2127_p11)
}
 0x376   :  { %s2153_s16 = smov 128   ;;  %s2154_s17 = smov 8  }
 0x377   :  { %1535 = dma.vmem_to_hbm [thread:$0]  %s1530_s9, 256, %s2308_s7, [#allocation4], %s2153_s16, %s2153_s16, %s2154_s17  }
 0x378   :  { %2137 = dma.done.wait [#allocation4], 256  }
 0x379   :  { %2138 = vsyncadd [#allocation4], 4294967040 }
 0x37a   :  { %1539 = vsyncpa [#allocation3], 1 }
 0x37b   :  { %1540 = vsyncpa [#allocation6], 1 }
 0x37c   :  { %1541 = vsyncpa [#allocation9], 1 }
 0x37d   :  { %1542 = vsyncpa [#allocation4], 1 }

</bundles_post_ra>
